<compile_context>
chip_gen: v5e
topology: v5e:2x2
jax: 0.10.0
libtpu: 0.0.40
codegen_flags: <defaults>
</compile_context>

<pallas_src>
import jax
import jax.numpy as jnp
from jax.experimental import pallas as pl
from jax.experimental.pallas import tpu as pltpu

_SMALL_PARAM_BYTES = 1 << 20  # below this, kernel launch >> copy cost


def _noise_copy_kernel(noise_hbm_ref, out_hbm_ref, sem):
    # Whole-parameter HBM->HBM DMA (the DMA engine alone drives HBM; no
    # vld/vst vreg round-trip and no (8,128) block constraints).
    cp = pltpu.make_async_copy(noise_hbm_ref, out_hbm_ref, sem)
    cp.start()
    cp.wait()


@jax.jit
def _noise_forward_pallas(noise_param):
    nbytes = noise_param.size * jnp.dtype(noise_param.dtype).itemsize
    return pl.pallas_call(
        _noise_copy_kernel,
        out_shape=jax.ShapeDtypeStruct(noise_param.shape, noise_param.dtype),
        in_specs=[pl.BlockSpec(memory_space=pl.ANY)],
        out_specs=pl.BlockSpec(memory_space=pl.ANY),
        scratch_shapes=[pltpu.SemaphoreType.DMA],
        # Advisory: pure memory-bound op; lets XLA schedule around it.
        cost_estimate=pl.CostEstimate(
            flops=0, transcendentals=0, bytes_accessed=2 * nbytes),
    )(noise_param)


def noise_forward(noise_param, *, force_kernel=False):
    """Pallas/JAX implementation of Noise.forward(): returns the parameter.

    The op is identity, so the default path returns the parameter directly
    (the highest-value optimization: zero extra HBM read+write).  When a
    kernel boundary is explicitly requested, a single HBM->HBM DMA copy of
    the raw (un-reshaped, un-padded) array is issued instead of a tiled
    VMEM round-trip copy.
    """
    nbytes = noise_param.size * jnp.dtype(noise_param.dtype).itemsize
    if not force_kernel and nbytes <= _SMALL_PARAM_BYTES:
        # Kernel launch + DMA setup dwarfs a tiny copy on every TPU gen.
        return noise_param
    # TODO(synk): if the caller donates the parameter (jax.jit donate_argnums),
    # an aliased no-op kernel (pltpu.touch on the aliased buffer) would drop
    # even the read+write; without donation that alias would force a
    # defensive XLA copy, so we keep the plain DMA copy here.
    return _noise_forward_pallas(noise_param)


if __name__ == "__main__":
    # Noise(*dim) with dim = (2, 4, 16, 16): parameter ~ randn(2, 4, 16, 16).
    key = jax.random.PRNGKey(0)
    noise_param = jax.random.normal(key, (2, 4, 16, 16), dtype=jnp.float32)

    # Fast path (true forward: identity, no copy).
    out_fast = jax.block_until_ready(noise_forward(noise_param))
    assert out_fast.shape == noise_param.shape
    assert out_fast.dtype == noise_param.dtype
    assert bool(jnp.all(out_fast == noise_param))

    # Kernel path (forced): exercises the single HBM->HBM DMA copy.
    out_kernel = jax.block_until_ready(
        noise_forward(noise_param, force_kernel=True))
    assert out_kernel.shape == noise_param.shape
    assert out_kernel.dtype == noise_param.dtype
    assert bool(jnp.all(out_kernel == noise_param))

    # Odd (non-128-divisible) shape: DMA path needs no pad/slice at all.
    odd_param = jax.random.normal(jax.random.PRNGKey(0), (3, 5, 7),
                                  dtype=jnp.float32)
    out_odd = jax.block_until_ready(noise_forward(odd_param, force_kernel=True))
    assert out_odd.shape == odd_param.shape
    assert bool(jnp.all(out_odd == odd_param))

    # Narrow dtype: byte-exact, no (8,128)/sublane-packing concerns on DMA.
    bf16_param = jax.random.normal(jax.random.PRNGKey(1), (2, 4, 16, 16),
                                   dtype=jnp.bfloat16)
    out_bf16 = jax.block_until_ready(
        noise_forward(bf16_param, force_kernel=True))
    assert out_bf16.dtype == jnp.bfloat16
    assert bool(jnp.all(out_bf16 == bf16_param))

    print("KERNEL_OK")
</pallas_src>

<mosaic_0001>
module attributes {stable_mosaic.version = 11 : i64} {
  func.func @_noise_copy_kernel(%arg0: memref<2x4x16x16xf32, #tpu.memory_space<any>>, %arg1: memref<2x4x16x16xf32, #tpu.memory_space<any>>, %arg2: memref<!tpu.dma_semaphore, #tpu.memory_space<semaphore_mem>>) attributes {dimension_semantics = [], scalar_prefetch = 0 : i64, scratch_operands = 1 : i64, tpu.core_type = #tpu.core_type<tc>} {
    tpu.enqueue_dma source(%arg0 : memref<2x4x16x16xf32, #tpu.memory_space<any>>) target(%arg1 : memref<2x4x16x16xf32, #tpu.memory_space<any>>) target_semaphore(%arg2 : memref<!tpu.dma_semaphore, #tpu.memory_space<semaphore_mem>>)
    tpu.wait_dma2 semaphore(%arg2 : memref<!tpu.dma_semaphore, #tpu.memory_space<semaphore_mem>>) src(%arg0 : memref<2x4x16x16xf32, #tpu.memory_space<any>>) dst(%arg1 : memref<2x4x16x16xf32, #tpu.memory_space<any>>)
    return
  }
}

</mosaic_0001>

<bundles_post_ra>
// kernel: _noise_forward_pallas.1
= control target key start
LH: loop header
LB: loop body
LE: loop exit
PB: predicated region body
PF: predicated region fallthrough
CT: control target
= control target key end

     0   :  { %s34_s12 = smov [#allocation2]   ;;  %s35_s13 = smov [#allocation3]   ;;  %s53_s0 = inlined_call_operand.hbm [shape: f32[2,4,16,16], index: 0, kind: input, shape index: {}]   ;;  %s54_s1 = inlined_call_operand.hbm [shape: f32[2,4,16,16], index: 1, kind: output, shape index: {}]  }
   0x1   :  { %s10_s8 = sshll.u32 %s53_s0, 4  ;;  %s12_s11 = sshll.u32 %s54_s1, 4  ;;  %s11_s8 = int_to_ptr.hbm [resolvable:$true] %s10_s8  ;;  %s13_s11 = int_to_ptr.hbm [resolvable:$true] %s12_s11 }
   0x2   :  { %s36_s14 = smov 0  }
   0x3   :  { %16 = dma.general %s11_s8, 2048, %s13_s11, %s34_s12, %s35_s13, [#allocation4], %s36_s14, 0  }
   0x4   :  { %32 = dma.done.wait [#allocation2], 2048 }
   0x5   :  { %33 = vsyncadd [#allocation2], 4294965248 }
   0x6   :  { %22 = vsyncmov [#allocation2] }
   0x9   :  { %s23_s15 = vpop.sfrf %22 }
   0xa   :  { %p28_p0 = scmp.ne.s32.totalorder %s23_s15, 0 }
   0xc   :  { %27 = shalt.err (%p28_p0)  }

</bundles_post_ra>
